<compile_context>
chip_gen: v7x
topology: tpu7x:2x2x1
jax: 0.10.0
libtpu: 0.0.40
codegen_flags: <defaults>
</compile_context>

<pallas_src>
import functools

import jax
import jax.numpy as jnp
from jax.experimental import pallas as pl
from jax.experimental.pallas import tpu as pltpu

PEP_LEN, TCRA_LEN, TCRB_LEN = 9, 116, 113          # fixed by self.pep / self.tcr_a / self.tcr_b
SEQ_LEN = PEP_LEN + TCRA_LEN + TCRB_LEN            # 238 conv output positions
POS_PAD = 256                                      # positions padded for clean (8,128) tiling
KSIZE = 3
PAD = 1                                            # 'same' padding for kernel_size=3
BN_EPS = 1e-5
NEG = -1e30                                        # masked-out positions for the max-pool


def _round_up(n, m):
    return ((n + m - 1) // m) * m


def _pack_layout(n_local, n_global, cnn_channels):
    """Static row offsets inside the two packed parameter slabs."""
    kc = KSIZE * n_local
    n_loc = 3 * cnn_channels
    n_loc_pad = _round_up(n_loc, 128)              # lane-dense conv-output width
    r_mb = _round_up(kc, 8)                        # mask+bias rows start (8-aligned)
    r_w1g = n_loc_pad
    r_b1 = r_w1g + _round_up(max(n_global, 1), 8)
    r_wo = r_b1 + 8
    r_bo = r_wo + 8
    return dict(kc=kc, n_loc=n_loc, n_loc_pad=n_loc_pad, r_mb=r_mb,
                r_w1g=r_w1g, r_b1=r_b1, r_wo=r_wo, r_bo=r_bo,
                conv_rows=r_mb + POS_PAD, dense_rows=r_bo + 8)


def prepare_operands(params, n_local, n_global):
    """Fold eval-mode BatchNorm into dense1 and pack all params into 2 slabs."""
    co = params["w_pep"].shape[0]
    d = params["w1"].shape[1]
    lay = _pack_layout(n_local, n_global, co)
    kc, n_loc, n_loc_pad = lay["kc"], lay["n_loc"], lay["n_loc_pad"]

    # stacked conv weights (K*C, 3*CO); feature index = c*K + k (PyTorch (O,C,K))
    flat = lambda w: w.reshape(co, kc).T
    wt = jnp.concatenate([flat(params["w_pep"]), flat(params["w_a"]),
                          flat(params["w_b"])], axis=1)
    bias = jnp.concatenate([params["b_pep"], params["b_a"], params["b_b"]])

    # mask+bias slab: bias where (position, channel) belong to the same segment,
    # -1e30 elsewhere -> masked max == per-segment AdaptiveMaxPool1d(1).
    pos = jnp.arange(POS_PAD)
    seg_of_pos = jnp.where(pos < PEP_LEN, 0,
                           jnp.where(pos < PEP_LEN + TCRA_LEN, 1,
                                     jnp.where(pos < SEQ_LEN, 2, -1)))
    seg_of_chan = jnp.arange(n_loc) // co
    mb = jnp.where(seg_of_pos[:, None] == seg_of_chan[None, :], bias[None, :], NEG)

    conv_slab = jnp.zeros((lay["conv_rows"], n_loc_pad), jnp.float32)
    conv_slab = conv_slab.at[:kc, :n_loc].set(wt)
    conv_slab = conv_slab.at[lay["r_mb"]:, :].set(NEG)
    conv_slab = conv_slab.at[lay["r_mb"]:, :n_loc].set(mb)

    # eval-mode BatchNorm folded into dense1: xn = feat*scale + shift
    scale = params["bn_gamma"] * jax.lax.rsqrt(params["bn_var"] + BN_EPS)
    shift = params["bn_beta"] - params["bn_mean"] * scale
    w1f = params["w1"] * scale[:, None]            # (F, D)
    b1f = params["b1"] + shift @ params["w1"]      # (D,)

    dense_slab = jnp.zeros((lay["dense_rows"], d), jnp.float32)
    dense_slab = dense_slab.at[:n_loc].set(w1f[:n_loc])
    dense_slab = dense_slab.at[lay["r_w1g"]:lay["r_w1g"] + n_global].set(w1f[n_loc:])
    dense_slab = dense_slab.at[lay["r_b1"]].set(b1f)
    dense_slab = dense_slab.at[lay["r_wo"]].set(params["wo"][:, 0])
    dense_slab = dense_slab.at[lay["r_bo"], 0].set(params["bo"])
    return conv_slab, dense_slab, lay


def _tcr_cnn_kernel(x_ref, glob_ref, conv_ref, dense_ref, out_ref, *,
                    tb, n_global, lay):
    kc, n_loc_pad = lay["kc"], lay["n_loc_pad"]

    # --- all three segment convs: ONE lane-dense MXU matmul over the im2col slab
    wt = conv_ref[0:kc, :]                                        # (K*C, n_loc_pad)
    y = jnp.dot(x_ref[...], wt, preferred_element_type=jnp.float32)
    y = y.reshape(tb, POS_PAD, n_loc_pad)                         # (tb, 256, n_loc_pad)

    # --- masked max == per-segment AdaptiveMaxPool1d; tanh after max (monotonic)
    mb = conv_ref[lay["r_mb"]:lay["r_mb"] + POS_PAD, :]           # (256, n_loc_pad)
    pooled = jnp.tanh(jnp.max(y + mb, axis=1))                    # (tb, n_loc_pad)

    # --- dense1 with folded BatchNorm; concat replaced by split matmuls
    w1_loc = dense_ref[0:n_loc_pad, :]                            # (n_loc_pad, D)
    w1_glb = dense_ref[lay["r_w1g"]:lay["r_w1g"] + n_global, :]   # (G, D)
    b1 = dense_ref[lay["r_b1"]:lay["r_b1"] + 1, :]                # (1, D)
    h = jnp.tanh(jnp.dot(pooled, w1_loc, preferred_element_type=jnp.float32)
                 + jnp.dot(glob_ref[...], w1_glb, preferred_element_type=jnp.float32)
                 + b1)                                            # (tb, D)

    # --- dense_out + sigmoid (stable tanh form, runs on the EUP)
    wo = dense_ref[lay["r_wo"]:lay["r_wo"] + 1, :]                # (1, D)
    bo = dense_ref[lay["r_bo"]:lay["r_bo"] + 1, 0:1]              # (1, 1)
    logit = jnp.sum(h * wo, axis=-1, keepdims=True) + bo          # (tb, 1)
    out_ref[...] = 0.5 * (jnp.tanh(0.5 * logit) + 1.0)


def tcr_cnn_forward(x, params, local_idx, global_idx, *, batch_block=None):
    """x: (B, n_total_features, 238) float32, NCW like the PyTorch module."""
    b = x.shape[0]
    n_local, n_global = len(local_idx), len(global_idx)

    local = jnp.take(x, jnp.asarray(local_idx, jnp.int32), axis=1).astype(jnp.float32)
    glob = jnp.take(x, jnp.asarray(global_idx, jnp.int32), axis=1)[:, :, 0].astype(jnp.float32)

    # batch tiling: one block for tiny B; >=8-row blocks on a parallel grid otherwise
    if batch_block is None:
        tb = b if b <= 8 else _round_up(pl.cdiv(b, 4), 8)
    else:
        tb = batch_block
    b_pad = _round_up(b, tb)

    # im2col: one row per conv-output position, per-segment 'same' zero padding,
    # feature index = c*K + k to match the PyTorch Conv1d weight layout (O, C, K).
    def im2col(seg):
        bb, c, length = seg.shape
        segp = jnp.pad(seg, ((0, 0), (0, 0), (PAD, PAD)))
        taps = jnp.stack([segp[:, :, k:k + length] for k in range(KSIZE)], axis=-1)
        return jnp.transpose(taps, (0, 2, 1, 3)).reshape(bb, length, c * KSIZE)

    cols = jnp.concatenate([
        im2col(local[:, :, :PEP_LEN]),
        im2col(local[:, :, PEP_LEN:PEP_LEN + TCRA_LEN]),
        im2col(local[:, :, PEP_LEN + TCRA_LEN:SEQ_LEN]),
    ], axis=1)                                                    # (B, 238, K*C)
    cols = jnp.pad(cols, ((0, b_pad - b), (0, POS_PAD - SEQ_LEN), (0, 0)))
    x2d = cols.reshape(b_pad * POS_PAD, KSIZE * n_local)          # lane-dense im2col slab
    glob_p = jnp.pad(glob, ((0, b_pad - b), (0, 0)))

    conv_slab, dense_slab, lay = prepare_operands(params, n_local, n_global)

    kernel = functools.partial(_tcr_cnn_kernel, tb=tb, n_global=n_global, lay=lay)
    out = pl.pallas_call(
        kernel,
        out_shape=jax.ShapeDtypeStruct((b_pad, 1), jnp.float32),
        grid=(b_pad // tb,),
        in_specs=[
            pl.BlockSpec((tb * POS_PAD, KSIZE * n_local), lambda i: (i, 0)),
            pl.BlockSpec((tb, n_global), lambda i: (i, 0)),
            pl.BlockSpec(conv_slab.shape, lambda i: (0, 0)),
            pl.BlockSpec(dense_slab.shape, lambda i: (0, 0)),
        ],
        out_specs=pl.BlockSpec((tb, 1), lambda i: (i, 0)),
        compiler_params=pltpu.CompilerParams(dimension_semantics=("parallel",)),
    )(x2d, glob_p, conv_slab, dense_slab)
    return out[:b]


def init_params(key, n_local, n_global, cnn_channels=30, dense_neurons=64):
    C, CO, G, D = n_local, cnn_channels, n_global, dense_neurons
    F = 3 * CO + G
    ks = jax.random.split(key, 10)

    def kaiming(k, shape, fan_in):
        return jax.random.normal(k, shape, jnp.float32) * jnp.sqrt(2.0 / fan_in)

    u = lambda k, shape, bnd: jax.random.uniform(k, shape, jnp.float32, -bnd, bnd)
    return dict(
        # conv weights in PyTorch Conv1d layout (out, in, K)
        w_pep=kaiming(ks[0], (CO, C, KSIZE), C * KSIZE),
        w_a=kaiming(ks[1], (CO, C, KSIZE), C * KSIZE),
        w_b=kaiming(ks[2], (CO, C, KSIZE), C * KSIZE),
        b_pep=u(ks[3], (CO,), 0.1), b_a=u(ks[4], (CO,), 0.1), b_b=u(ks[5], (CO,), 0.1),
        # dense weights stored pre-transposed as (in, out)
        w1=kaiming(ks[6], (F, D), F),
        b1=u(ks[7], (D,), 0.1),
        wo=kaiming(ks[8], (D, 1), D),
        bo=u(ks[9], (), 0.1),
        # BatchNorm1d(F) eval-mode parameters / running stats (fresh init)
        bn_gamma=jnp.ones((F,), jnp.float32),
        bn_beta=jnp.zeros((F,), jnp.float32),
        bn_mean=jnp.zeros((F,), jnp.float32),
        bn_var=jnp.ones((F,), jnp.float32),
    )


def _reference_forward(x, params, local_idx, global_idx):
    """Pure-JAX reference matching the PyTorch forward (eval mode)."""
    hp = jax.lax.Precision.HIGHEST
    local = x[:, jnp.asarray(local_idx), :]
    glob = x[:, jnp.asarray(global_idx), 0]

    def conv_pool(seg, w, bias):
        length = seg.shape[-1]
        segp = jnp.pad(seg, ((0, 0), (0, 0), (PAD, PAD)))
        y = sum(jnp.einsum("oc,bcl->bol", w[:, :, k], segp[:, :, k:k + length],
                           precision=hp) for k in range(KSIZE))
        return jnp.max(jnp.tanh(y + bias[None, :, None]), axis=-1)

    feat = jnp.concatenate([
        conv_pool(local[:, :, :PEP_LEN], params["w_pep"], params["b_pep"]),
        conv_pool(local[:, :, PEP_LEN:PEP_LEN + TCRA_LEN], params["w_a"], params["b_a"]),
        conv_pool(local[:, :, PEP_LEN + TCRA_LEN:SEQ_LEN], params["w_b"], params["b_b"]),
        glob], axis=1)
    xn = (feat - params["bn_mean"]) * jax.lax.rsqrt(params["bn_var"] + BN_EPS)
    xn = xn * params["bn_gamma"] + params["bn_beta"]
    h = jnp.tanh(jnp.dot(xn, params["w1"], precision=hp) + params["b1"])
    logit = jnp.dot(h, params["wo"], precision=hp) + params["bo"]
    return jax.nn.sigmoid(logit)


if __name__ == "__main__":
    key = jax.random.PRNGKey(0)
    kx, kp = jax.random.split(key)

    B = 2
    local_idx = list(range(6))        # 6 local (per-position) feature channels
    global_idx = list(range(6, 10))   # 4 global feature channels
    n_total = len(local_idx) + len(global_idx)

    x = jax.random.normal(kx, (B, n_total, SEQ_LEN), jnp.float32)
    params = init_params(kp, n_local=len(local_idx), n_global=len(global_idx))

    # TODO(synk): the `return_pool` / AdaptiveMaxPool1d(return_indices=True) debug
    # branch (dead with the default return_pool=False) is not implemented.
    out = jax.block_until_ready(tcr_cnn_forward(x, params, local_idx, global_idx))
    ref = jax.block_until_ready(_reference_forward(x, params, local_idx, global_idx))

    assert out.shape == (B, 1) and out.dtype == jnp.float32
    assert bool(jnp.all(jnp.isfinite(out)))
    assert bool(jnp.max(jnp.abs(out - ref)) < 2e-3), "mismatch vs pure-JAX reference"
    print("KERNEL_OK")
</pallas_src>

<mosaic_0001>
module attributes {stable_mosaic.version = 11 : i64} {
  func.func @_tcr_cnn_kernel(%arg0: i32, %arg1: memref<512x18xf32, #tpu.memory_space<vmem>>, %arg2: memref<2x4xf32, #tpu.memory_space<vmem>>, %arg3: memref<280x128xf32, #tpu.memory_space<vmem>>, %arg4: memref<160x64xf32, #tpu.memory_space<vmem>>, %arg5: memref<2x1xf32, #tpu.memory_space<vmem>>) attributes {dimension_semantics = [#tpu.dimension_semantics<parallel>], iteration_bounds = array<i64: 1>, scalar_prefetch = 0 : i64, scratch_operands = 0 : i64, tpu.core_type = #tpu.core_type<tc>, window_params = [{transform_indices = @transform_0, window_bounds = array<i64: 512, 18>}, {transform_indices = @transform_1, window_bounds = array<i64: 2, 4>}, {pipeline_mode = #tpu.pipeline_mode<synchronous>, transform_indices = @transform_2, window_bounds = array<i64: 280, 128>}, {pipeline_mode = #tpu.pipeline_mode<synchronous>, transform_indices = @transform_3, window_bounds = array<i64: 160, 64>}, {transform_indices = @transform_4, window_bounds = array<i64: 2, 1>}]} {
    %c0 = arith.constant 0 : index
    %c0_0 = arith.constant 0 : index
    %0 = vector.load %arg3[%c0, %c0_0] : memref<280x128xf32, #tpu.memory_space<vmem>>, vector<18x128xf32>
    %c0_1 = arith.constant 0 : index
    %c0_2 = arith.constant 0 : index
    %1 = vector.load %arg1[%c0_1, %c0_2] : memref<512x18xf32, #tpu.memory_space<vmem>>, vector<512x18xf32>
    %cst = arith.constant dense<0.000000e+00> : vector<512x128xf32>
    %2 = tpu.matmul %1, %0, %cst {dimension_numbers = #tpu.dot_dimension_numbers<[1], [0], [0], [1], [0, 0, 1, 1], [], []>} : vector<512x18xf32>, vector<18x128xf32>, vector<512x128xf32> -> vector<512x128xf32>
    %3 = vector.shape_cast %2 : vector<512x128xf32> to vector<2x256x128xf32>
    %c24 = arith.constant 24 : index
    %c0_3 = arith.constant 0 : index
    %4 = vector.load %arg3[%c24, %c0_3] : memref<280x128xf32, #tpu.memory_space<vmem>>, vector<256x128xf32>
    %5 = vector.shape_cast %4 : vector<256x128xf32> to vector<1x256x128xf32>
    %6 = vector.broadcast %5 : vector<1x256x128xf32> to vector<2x256x128xf32>
    %7 = arith.addf %3, %6 : vector<2x256x128xf32>
    %cst_4 = arith.constant dense<0xFF800000> : vector<2x128xf32>
    %8 = vector.multi_reduction <maximumf>, %7, %cst_4 [1] : vector<2x256x128xf32> to vector<2x128xf32>
    %9 = math.tanh %8 : vector<2x128xf32>
    %c0_5 = arith.constant 0 : index
    %c0_6 = arith.constant 0 : index
    %10 = vector.load %arg4[%c0_5, %c0_6] : memref<160x64xf32, #tpu.memory_space<vmem>>, vector<128x64xf32>
    %c128 = arith.constant 128 : index
    %c0_7 = arith.constant 0 : index
    %11 = vector.load %arg4[%c128, %c0_7] : memref<160x64xf32, #tpu.memory_space<vmem>>, vector<4x64xf32>
    %c136 = arith.constant 136 : index
    %c0_8 = arith.constant 0 : index
    %12 = vector.load %arg4[%c136, %c0_8] : memref<160x64xf32, #tpu.memory_space<vmem>>, vector<1x64xf32>
    %cst_9 = arith.constant dense<0.000000e+00> : vector<2x64xf32>
    %13 = tpu.matmul %9, %10, %cst_9 {dimension_numbers = #tpu.dot_dimension_numbers<[1], [0], [0], [1], [0, 0, 1, 1], [], []>} : vector<2x128xf32>, vector<128x64xf32>, vector<2x64xf32> -> vector<2x64xf32>
    %c0_10 = arith.constant 0 : index
    %c0_11 = arith.constant 0 : index
    %14 = vector.load %arg2[%c0_10, %c0_11] : memref<2x4xf32, #tpu.memory_space<vmem>>, vector<2x4xf32>
    %cst_12 = arith.constant dense<0.000000e+00> : vector<2x64xf32>
    %15 = tpu.matmul %14, %11, %cst_12 {dimension_numbers = #tpu.dot_dimension_numbers<[1], [0], [0], [1], [0, 0, 1, 1], [], []>} : vector<2x4xf32>, vector<4x64xf32>, vector<2x64xf32> -> vector<2x64xf32>
    %16 = arith.addf %13, %15 : vector<2x64xf32>
    %17 = vector.broadcast %12 : vector<1x64xf32> to vector<2x64xf32>
    %18 = arith.addf %16, %17 : vector<2x64xf32>
    %19 = math.tanh %18 : vector<2x64xf32>
    %c144 = arith.constant 144 : index
    %c0_13 = arith.constant 0 : index
    %20 = vector.load %arg4[%c144, %c0_13] : memref<160x64xf32, #tpu.memory_space<vmem>>, vector<1x64xf32>
    %c152 = arith.constant 152 : index
    %c0_14 = arith.constant 0 : index
    %21 = vector.load %arg4[%c152, %c0_14] : memref<160x64xf32, #tpu.memory_space<vmem>>, vector<1x1xf32>
    %22 = vector.broadcast %20 : vector<1x64xf32> to vector<2x64xf32>
    %23 = arith.mulf %19, %22 : vector<2x64xf32>
    %cst_15 = arith.constant dense<0.000000e+00> : vector<2xf32>
    %24 = vector.multi_reduction <add>, %23, %cst_15 [1] : vector<2x64xf32> to vector<2xf32>
    %25 = vector.shape_cast %24 : vector<2xf32> to vector<2x1xf32>
    %26 = vector.broadcast %21 : vector<1x1xf32> to vector<2x1xf32>
    %27 = arith.addf %25, %26 : vector<2x1xf32>
    %cst_16 = arith.constant 5.000000e-01 : f32
    %28 = vector.broadcast %cst_16 : f32 to vector<2x1xf32>
    %29 = arith.mulf %28, %27 : vector<2x1xf32>
    %30 = math.tanh %29 : vector<2x1xf32>
    %cst_17 = arith.constant 1.000000e+00 : f32
    %31 = vector.broadcast %cst_17 : f32 to vector<2x1xf32>
    %32 = arith.addf %30, %31 : vector<2x1xf32>
    %cst_18 = arith.constant 5.000000e-01 : f32
    %33 = vector.broadcast %cst_18 : f32 to vector<2x1xf32>
    %34 = arith.mulf %33, %32 : vector<2x1xf32>
    %c0_19 = arith.constant 0 : index
    %c0_20 = arith.constant 0 : index
    %35 = vector.load %arg5[%c0_19, %c0_20] : memref<2x1xf32, #tpu.memory_space<vmem>>, vector<2x1xf32>
    tpu.vector_store %arg5[%c0_19, %c0_20], %34 {strides = array<i32>} : memref<2x1xf32, #tpu.memory_space<vmem>>, vector<2x1xf32>,
    return
  }
  func.func @transform_0(%arg0: i32) -> (i32, i32) {
    %c0_i32 = arith.constant 0 : i32
    %c0_i32_0 = arith.constant 0 : i32
    return %arg0, %c0_i32 : i32, i32
  }
  func.func @transform_1(%arg0: i32) -> (i32, i32) {
    %c0_i32 = arith.constant 0 : i32
    %c0_i32_0 = arith.constant 0 : i32
    return %arg0, %c0_i32 : i32, i32
  }
  func.func @transform_2(%arg0: i32) -> (i32, i32) {
    %c0_i32 = arith.constant 0 : i32
    %c0_i32_0 = arith.constant 0 : i32
    %c0_i32_1 = arith.constant 0 : i32
    return %c0_i32, %c0_i32_0 : i32, i32
  }
  func.func @transform_3(%arg0: i32) -> (i32, i32) {
    %c0_i32 = arith.constant 0 : i32
    %c0_i32_0 = arith.constant 0 : i32
    %c0_i32_1 = arith.constant 0 : i32
    return %c0_i32, %c0_i32_0 : i32, i32
  }
  func.func @transform_4(%arg0: i32) -> (i32, i32) {
    %c0_i32 = arith.constant 0 : i32
    %c0_i32_0 = arith.constant 0 : i32
    return %arg0, %c0_i32 : i32, i32
  }
}

</mosaic_0001>

<bundles_post_ra>
// kernel: tpu_custom_call.1
= control target key start
LH: loop header
LB: loop body
LE: loop exit
PB: predicated region body
PF: predicated region fallthrough
CT: control target
= control target key end

     0   :  { %vm84_vm0 = vcmask 146432   ;;  %vm277_vm1 = vcmask 1041408   ;;  %vm861_vm2 = vcmask 1043456   ;;  %vm1384_vm3 = vmmov 0   ;;  %s2032_s2 = inlined_call_operand.vmem [shape: f32[280,128], index: 2, kind: input, shape index: {}]   ;;  %s2033_s0 = inlined_call_operand.vmem [shape: f32[512,18], index: 0, kind: input, shape index: {}]   ;;  %s2034_s3 = inlined_call_operand.vmem [shape: f32[160,64], index: 3, kind: input, shape index: {}]   ;;  %s2035_s1 = inlined_call_operand.vmem [shape: f32[2,4], index: 1, kind: input, shape index: {}]   ;;  %s2036_s4 = inlined_call_operand.vmem [shape: f32[2,1], index: 4, kind: output, shape index: {}]  }
   0x1   :  { %v17_v0 = vld [vmem:[%s2032_s2] sm:$0xff]  ;;  %v18_v1 = vld [vmem:[%s2032_s2 + $0x8] sm:$0xff]  ;;  %v19_v4 = vld [vmem:[%s2032_s2 + $0x10] sm:$0x3]  ;;  %vm857_vm4 = vcmask 31744   ;;  %vm937_vm5 = vcmask 1041409  }
   0x2   :  { %v1340_v2 = vpack.c.bf16 %v18_v1, %v17_v0  ;;  %v20_v3 = vld [vmem:[%s2033_s0] sm:$0xff]  ;;  %v21_v5 = vld [vmem:[%s2033_s0 + $0x8] sm:$0xff]  ;;  %v22_v6 = vld [vmem:[%s2033_s0 + $0x10] sm:$0xff]  ;;  %vm1023_vm6 = vcmask 517120   ;;  %vm1036_vm7 = vcmask 1024  }
   0x3   :  { %1204 = vmatprep.mubr.msk.f32.mxu0 %vm84_vm0, %v20_v3  ;;  %v23_v7 = vld [vmem:[%s2033_s0 + $0x18] sm:$0xff]  ;;  %v24_v8 = vld [vmem:[%s2033_s0 + $0x20] sm:$0xff]  ;;  %v62_v9 = vld [vmem:[%s2033_s0 + $0x150] sm:$0xff] }
   0x4   :  { %1341 = vmatprep.subr.bf16.mxu0 %v1340_v2  ;;  %1368 = vmatprep.subr.bf16.mxu1 %v1340_v2  ;;  %v63_v10 = vld [vmem:[%s2033_s0 + $0x158] sm:$0xff]  ;;  %v64_v11 = vld [vmem:[%s2033_s0 + $0x160] sm:$0xff]  ;;  %v25_v12 = vld [vmem:[%s2033_s0 + $0x28] sm:$0xff] }
   0x5   :  { %1343 = vmatpush3.bf16.msra.mxu0 %v1340_v2  ;;  %1370 = vmatpush3.bf16.msra.mxu1 %v1340_v2  ;;  %v65_v13 = vld [vmem:[%s2033_s0 + $0x168] sm:$0xff]  ;;  %v26_v14 = vld [vmem:[%s2033_s0 + $0x30] sm:$0xff]  ;;  %v27_v16 = vld [vmem:[%s2033_s0 + $0x38] sm:$0xff] }
   0x6   :  { %1202 = vmatprep.subr.msk.mxu0 %vm277_vm1, %v19_v4  ;;  %1369 = vmatprep.subr.msk.mxu1 %vm277_vm1, %v19_v4  ;;  %v66_v15 = vld [vmem:[%s2033_s0 + $0x170] sm:$0xff]  ;;  %v67_v17 = vld [vmem:[%s2033_s0 + $0x178] sm:$0xff]  ;;  %v28_v18 = vld [vmem:[%s2033_s0 + $0x40] sm:$0xff] }
   0x7   :  { %1267 = vmatprep.mubr.msk.f32.mxu1 %vm84_vm0, %v62_v9  ;;  %v68_v19 = vld [vmem:[%s2033_s0 + $0x180] sm:$0xff]  ;;  %v29_v20 = vld [vmem:[%s2033_s0 + $0x48] sm:$0xff]  ;;  %v30_v22 = vld [vmem:[%s2033_s0 + $0x50] sm:$0xff] }
   0x8   :  { %v69_v21 = vld [vmem:[%s2033_s0 + $0x188] sm:$0xff]  ;;  %v70_v23 = vld [vmem:[%s2033_s0 + $0x190] sm:$0xff]  ;;  %v31_v24 = vld [vmem:[%s2033_s0 + $0x58] sm:$0xff] }
   0x9   :  { %1203 = vmatpush3.msk.msra.mxu0 %vm277_vm1, %v19_v4  ;;  %1371 = vmatpush3.msk.msra.mxu1 %vm277_vm1, %v19_v4  ;;  %v71_v25 = vld [vmem:[%s2033_s0 + $0x198] sm:$0xff]  ;;  %v32_v26 = vld [vmem:[%s2033_s0 + $0x60] sm:$0xff]  ;;  %v33_v28 = vld [vmem:[%s2033_s0 + $0x68] sm:$0xff]  ;;  %v1383_v4 = vmov 0.0  }
   0xa   :  { %1205 = vmatmul.mubr.msk.f32.vlgmr.msra.gmra.mrb[0].mxu0 %vm84_vm0, %v21_v5  ;;  %1268 = vmatmul.mubr.msk.f32.vlgmr.msra.gmra.mrb[0].mxu1 %vm84_vm0, %v63_v10  ;;  %v72_v27 = vld [vmem:[%s2033_s0 + $0x1a0] sm:$0xff]  ;;  %v73_v29 = vld [vmem:[%s2033_s0 + $0x1a8] sm:$0xff]  ;;  %v34_v30 = vld [vmem:[%s2033_s0 + $0x70] sm:$0xff]  ;;  %v1385_v10 = vmov 0.0|0.0  }
   0xb   :  { %1207 = vmatprep.mubr.msk.f32.mxu0 %vm84_vm0, %v22_v6  ;;  %1270 = vmatprep.mubr.msk.f32.mxu1 %vm84_vm0, %v64_v11  ;;  %v74_v31 = vld [vmem:[%s2033_s0 + $0x1b0] sm:$0xff]  ;;  %v35_v32 = vld [vmem:[%s2033_s0 + $0x78] sm:$0xff]  ;;  %v36_v34 = vld [vmem:[%s2033_s0 + $0x80] sm:$0xff] }
   0xc   :  { %v75_v33 = vld [vmem:[%s2033_s0 + $0x1b8] sm:$0xff]  ;;  %v76_v35 = vld [vmem:[%s2033_s0 + $0x1c0] sm:$0xff]  ;;  %v37_v36 = vld [vmem:[%s2033_s0 + $0x88] sm:$0xff]  ;;  %1300 = vmatprep.subr.mxu1 %v1383_v4 }
   0xd   :  { %v77_v37 = vld [vmem:[%s2033_s0 + $0x1c8] sm:$0xff]  ;;  %v38_v38 = vld [vmem:[%s2033_s0 + $0x90] sm:$0xff]  ;;  %v39_v40 = vld [vmem:[%s2033_s0 + $0x98] sm:$0xff] }
   0xe   :  { %1208 = vmatmul.mubr.msk.f32.gmra.mrb[2].mxu0 %vm84_vm0, %v23_v7  ;;  %1271 = vmatmul.mubr.msk.f32.gmra.mrb[2].mxu1 %vm84_vm0, %v65_v13  ;;  %v78_v39 = vld [vmem:[%s2033_s0 + $0x1d0] sm:$0xff]  ;;  %v79_v41 = vld [vmem:[%s2033_s0 + $0x1d8] sm:$0xff]  ;;  %v40_v42 = vld [vmem:[%s2033_s0 + $0xa0] sm:$0xff] }
   0xf   :  { %1210 = vmatprep.mubr.msk.f32.mxu0 %vm84_vm0, %v24_v8  ;;  %1273 = vmatprep.mubr.msk.f32.mxu1 %vm84_vm0, %v66_v15  ;;  %v80_v43 = vld [vmem:[%s2033_s0 + $0x1e0] sm:$0xff]  ;;  %v41_v44 = vld [vmem:[%s2033_s0 + $0xa8] sm:$0xff]  ;;  %v42_v46 = vld [vmem:[%s2033_s0 + $0xb0] sm:$0xff] }
  0x10   :  { %v81_v45 = vld [vmem:[%s2033_s0 + $0x1e8] sm:$0xff]  ;;  %v82_v47 = vld [vmem:[%s2033_s0 + $0x1f0] sm:$0xff]  ;;  %v43_v48 = vld [vmem:[%s2033_s0 + $0xb8] sm:$0xff] }
  0x11   :  { %v83_v49 = vld [vmem:[%s2033_s0 + $0x1f8] sm:$0xff]  ;;  %v44_v50 = vld [vmem:[%s2033_s0 + $0xc0] sm:$0xff]  ;;  %v45_v51 = vld [vmem:[%s2033_s0 + $0xc8] sm:$0xff] }
  0x12   :  { %1211 = vmatmul.mubr.msk.f32.gmra.mrb[4].mxu0 %vm84_vm0, %v25_v12  ;;  %1274 = vmatmul.mubr.msk.f32.gmra.mrb[4].mxu1 %vm84_vm0, %v67_v17  ;;  %v46_v52 = vld [vmem:[%s2033_s0 + $0xd0] sm:$0xff]  ;;  %v47_v53 = vld [vmem:[%s2033_s0 + $0xd8] sm:$0xff]  ;;  %v48_v54 = vld [vmem:[%s2033_s0 + $0xe0] sm:$0xff] }
  0x13   :  { %1213 = vmatprep.mubr.msk.f32.mxu0 %vm84_vm0, %v26_v14  ;;  %1276 = vmatprep.mubr.msk.f32.mxu1 %vm84_vm0, %v68_v19  ;;  %v49_v55 = vld [vmem:[%s2033_s0 + $0xe8] sm:$0xff]  ;;  %v50_v56 = vld [vmem:[%s2033_s0 + $0xf0] sm:$0xff]  ;;  %v51_v57 = vld [vmem:[%s2033_s0 + $0xf8] sm:$0xff] }
  0x14   :  { %v52_v58 = vld [vmem:[%s2033_s0 + $0x100] sm:$0xff]  ;;  %v53_v59 = vld [vmem:[%s2033_s0 + $0x108] sm:$0xff]  ;;  %v54_v60 = vld [vmem:[%s2033_s0 + $0x110] sm:$0xff] }
  0x15   :  { %v55_v61 = vld [vmem:[%s2033_s0 + $0x118] sm:$0xff]  ;;  %v56_v62 = vld [vmem:[%s2033_s0 + $0x120] sm:$0xff]  ;;  %v57_v63 = vld [vmem:[%s2033_s0 + $0x128] sm:$0xff] }
  0x16   :  { %1214 = vmatmul.mubr.msk.f32.gmra.mrb[6].mxu0 %vm84_vm0, %v27_v16  ;;  %1277 = vmatmul.mubr.msk.f32.gmra.mrb[6].mxu1 %vm84_vm0, %v69_v21  ;;  %v58_v0 = vld [vmem:[%s2033_s0 + $0x130] sm:$0xff]  ;;  %v59_v1 = vld [vmem:[%s2033_s0 + $0x138] sm:$0xff]  ;;  %v60_v2 = vld [vmem:[%s2033_s0 + $0x140] sm:$0xff] }
  0x17   :  { %1216 = vmatprep.mubr.msk.f32.mxu0 %vm84_vm0, %v28_v18  ;;  %1279 = vmatprep.mubr.msk.f32.mxu1 %vm84_vm0, %v70_v23  ;;  %v61_v3 = vld [vmem:[%s2033_s0 + $0x148] sm:$0xff]  ;;  %v854_v5 = vld [vmem:[%s2034_s3 + $0x80] sm:$0xf]  ;;  %v840_v11 = vld [vmem:[%s2034_s3 + $0x10] sm:$0xff] }
  0x18   :  { %1301 = vmatpush3.msk.msra.mxu1 %vm861_vm2, %v854_v5  ;;  %v838_v6 = vld [vmem:[%s2034_s3] sm:$0xff]  ;;  %v839_v7 = vld [vmem:[%s2034_s3 + $0x8] sm:$0xff]  ;;  %v841_v12 = vld [vmem:[%s2034_s3 + $0x18] sm:$0xff] }
  0x19   :  { %v856_v8 = vld [vmem:[%s2035_s1] sm:$0x3]  ;;  %v1345_v9 = vpack.c.bf16 %v839_v7, %v838_v6  ;;  %1344 = vmatprep.subr.bf16.mxu1 %v1385_v10  ;;  %v1348_v13 = vpack.c.bf16 %v841_v12, %v840_v11  ;;  %v843_v15 = vld [vmem:[%s2034_s3 + $0x28] sm:$0xff]  ;;  %v844_v17 = vld [vmem:[%s2034_s3 + $0x30] sm:$0xff] }
  0x1a   :  { %1217 = vmatmul.mubr.msk.f32.gmra.mrb[8].mxu0 %vm84_vm0, %v29_v20  ;;  %1280 = vmatmul.mubr.msk.f32.gmra.mrb[8].mxu1 %vm84_vm0, %v71_v25  ;;  %v842_v14 = vld [vmem:[%s2034_s3 + $0x20] sm:$0xff]  ;;  %v845_v18 = vld [vmem:[%s2034_s3 + $0x38] sm:$0xff]  ;;  %v847_v21 = vld [vmem:[%s2034_s3 + $0x48] sm:$0xff] }
  0x1b   :  { %1219 = vmatprep.mubr.msk.f32.mxu0 %vm84_vm0, %v30_v22  ;;  %1282 = vmatprep.mubr.msk.f32.mxu1 %vm84_vm0, %v72_v27  ;;  %v1351_v16 = vpack.c.bf16 %v843_v15, %v842_v14  ;;  %v1354_v19 = vpack.c.bf16 %v845_v18, %v844_v17  ;;  %v846_v20 = vld [vmem:[%s2034_s3 + $0x40] sm:$0xff]  ;;  %v848_v23 = vld [vmem:[%s2034_s3 + $0x50] sm:$0xff]  ;;  %v851_v27 = vld [vmem:[%s2034_s3 + $0x68] sm:$0xff] }
  0x1c   :  { %v1357_v22 = vpack.c.bf16 %v847_v21, %v846_v20  ;;  %v1809_v12 = vld [vmem:[%s2032_s2 + $0x70] sm:$0xff]  ;;  %v1814_v14 = vld [vmem:[%s2032_s2 + $0x68] sm:$0xff] }
  0x1e   :  { %1220 = vmatmul.mubr.msk.f32.gmra.mrb[10].mxu0 %vm84_vm0, %v31_v24  ;;  %1283 = vmatmul.mubr.msk.f32.gmra.mrb[10].mxu1 %vm84_vm0, %v73_v29  ;;  %v849_v24 = vld [vmem:[%s2034_s3 + $0x58] sm:$0xff]  ;;  %v852_v29 = vld [vmem:[%s2034_s3 + $0x70] sm:$0xff] }
  0x1f   :  { %1222 = vmatprep.mubr.msk.f32.mxu0 %vm84_vm0, %v32_v26  ;;  %1285 = vmatprep.mubr.msk.f32.mxu1 %vm84_vm0, %v74_v31  ;;  %v1360_v25 = vpack.c.bf16 %v849_v24, %v848_v23  ;;  %v850_v26 = vld [vmem:[%s2034_s3 + $0x60] sm:$0xff]  ;;  %v1830_v24 = vld [vmem:[%s2032_s2 + $0x78] sm:$0xff] }
  0x22   :  { %1223 = vmatmul.mubr.msk.f32.gmra.mrb[12].mxu0 %vm84_vm0, %v33_v28  ;;  %1286 = vmatmul.mubr.msk.f32.gmra.mrb[12].mxu1 %vm84_vm0, %v75_v33  ;;  %v1363_v28 = vpack.c.bf16 %v851_v27, %v850_v26 }
  0x23   :  { %1225 = vmatprep.mubr.msk.f32.mxu0 %vm84_vm0, %v34_v30  ;;  %1288 = vmatprep.mubr.msk.f32.mxu1 %vm84_vm0, %v76_v35  ;;  %v853_v30 = vld [vmem:[%s2034_s3 + $0x78] sm:$0xff]  ;;  %v1738_v35 = vld [vmem:[%s2032_s2 + $0x30] sm:$0xff] }
  0x24   :  { %v1366_v31 = vpack.c.bf16 %v853_v30, %v852_v29 }
  0x26   :  { %1226 = vmatmul.mubr.msk.f32.gmra.mrb[14].mxu0 %vm84_vm0, %v35_v32  ;;  %1289 = vmatmul.mubr.msk.f32.gmra.mrb[14].mxu1 %vm84_vm0, %v77_v37  ;;  %v1748_v37 = vld [vmem:[%s2032_s2 + $0x28] sm:$0xff] }
  0x27   :  { %1228 = vmatprep.mubr.msk.f32.mxu0 %vm84_vm0, %v36_v34  ;;  %1291 = vmatprep.mubr.msk.f32.mxu1 %vm84_vm0, %v78_v39  ;;  %v1733_v34 = vld [vmem:[%s2032_s2 + $0x20] sm:$0xff] }
  0x2a   :  { %1229 = vmatmul.mubr.msk.f32.gmra.mrb[16].mxu0 %vm84_vm0, %v37_v36  ;;  %1292 = vmatmul.mubr.msk.f32.gmra.mrb[16].mxu1 %vm84_vm0, %v79_v41  ;;  %v1743_v36 = vld [vmem:[%s2032_s2 + $0x18] sm:$0xff] }
  0x2b   :  { %1231 = vmatprep.mubr.msk.f32.mxu0 %vm84_vm0, %v38_v38  ;;  %1294 = vmatprep.mubr.msk.f32.mxu1 %vm84_vm0, %v80_v43 }
  0x2e   :  { %1232 = vmatmul.mubr.msk.f32.gmra.mrb[18].mxu0 %vm84_vm0, %v39_v40  ;;  %1295 = vmatmul.mubr.msk.f32.gmra.mrb[18].mxu1 %vm84_vm0, %v81_v45 }
  0x2f   :  { %1234 = vmatprep.mubr.msk.f32.mxu0 %vm84_vm0, %v40_v42  ;;  %1297 = vmatprep.mubr.msk.f32.mxu1 %vm84_vm0, %v82_v47 }
  0x32   :  { %1235 = vmatmul.mubr.msk.f32.gmra.mrb[20].mxu0 %vm84_vm0, %v41_v44  ;;  %1298 = vmatmul.mubr.msk.f32.gmra.mrb[20].mxu1 %vm84_vm0, %v83_v49 }
  0x33   :  { %1237 = vmatprep.mubr.msk.f32.mxu0 %vm84_vm0, %v42_v46  ;;  %1302 = vmatprep.mubr.msk.f32.mxu1 %vm1384_vm3, %v1383_v4  ;;  %v1761_v46 = vld [vmem:[%s2032_s2 + $0x40] sm:$0xff] }
  0x36   :  { %1238 = vmatmul.mubr.msk.f32.gmra.mrb[22].mxu0 %vm84_vm0, %v43_v48  ;;  %1303 = vmatmul.mubr.msk.f32.vlgmr.msra.gmra.mrb[22].mxu1 %vm857_vm4, %v856_v8  ;;  %v1766_v48 = vld [vmem:[%s2032_s2 + $0x38] sm:$0xff] }
  0x37   :  { %1240 = vmatprep.mubr.msk.f32.mxu0 %vm84_vm0, %v44_v50  ;;  %1346 = vmatpush3.bf16.msra.mxu1 %v1345_v9 }
  0x38   :  { %1337 = vmatprep.mubr.msk.f32.mxu1 %vm1384_vm3, %v1383_v4  ;;  %1347 = vmatprep.subr.bf16.mxu1 %v1385_v10  ;;  %v1798_v4 = vld [vmem:[%s2032_s2 + $0x58] sm:$0xff] }
  0x3a   :  { %1241 = vmatmul.mubr.msk.f32.gmra.mrb[24].mxu0 %vm84_vm0, %v45_v51 }
  0x3b   :  { %1243 = vmatprep.mubr.msk.f32.mxu0 %vm84_vm0, %v46_v52  ;;  %1349 = vmatpush3.bf16.msra.mxu1 %v1348_v13 }
  0x3c   :  { %1350 = vmatprep.subr.bf16.mxu1 %v1385_v10 }
  0x3e   :  { %1244 = vmatmul.mubr.msk.f32.gmra.mrb[26].mxu0 %vm84_vm0, %v47_v53 }
  0x3f   :  { %1246 = vmatprep.mubr.msk.f32.mxu0 %vm84_vm0, %v48_v54  ;;  %1352 = vmatpush3.bf16.msra.mxu1 %v1351_v16 }
  0x40   :  { %1353 = vmatprep.subr.bf16.mxu1 %v1385_v10 }
  0x42   :  { %1247 = vmatmul.mubr.msk.f32.gmra.mrb[28].mxu0 %vm84_vm0, %v49_v55 }
  0x43   :  { %1249 = vmatprep.mubr.msk.f32.mxu0 %vm84_vm0, %v50_v56  ;;  %1355 = vmatpush3.bf16.msra.mxu1 %v1354_v19  ;;  %v1777_v56 = vld [vmem:[%s2032_s2 + $0x50] sm:$0xff] }
  0x44   :  { %1356 = vmatprep.subr.bf16.mxu1 %v1385_v10 }
  0x46   :  { %1250 = vmatmul.mubr.msk.f32.gmra.mrb[30].mxu0 %vm84_vm0, %v51_v57 }
  0x47   :  { %1252 = vmatprep.mubr.msk.f32.mxu0 %vm84_vm0, %v52_v58  ;;  %1358 = vmatpush3.bf16.msra.mxu1 %v1357_v22  ;;  %v1782_v58 = vld [vmem:[%s2032_s2 + $0x48] sm:$0xff]  ;;  %v1825_v22 = vld [vmem:[%s2032_s2 + $0x80] sm:$0xff] }
  0x48   :  { %1359 = vmatprep.subr.bf16.mxu1 %v1385_v10 }
  0x4a   :  { %1253 = vmatmul.mubr.msk.f32.gmra.mrb[32].mxu0 %vm84_vm0, %v53_v59 }
  0x4b   :  { %1255 = vmatprep.mubr.msk.f32.mxu0 %vm84_vm0, %v54_v60  ;;  %1361 = vmatpush3.bf16.msra.mxu1 %v1360_v25 }
  0x4c   :  { %1362 = vmatprep.subr.bf16.mxu1 %v1385_v10 }
  0x4e   :  { %1256 = vmatmul.mubr.msk.f32.gmra.mrb[34].mxu0 %vm84_vm0, %v55_v61 }
  0x4f   :  { %1258 = vmatprep.mubr.msk.f32.mxu0 %vm84_vm0, %v56_v62  ;;  %1364 = vmatpush3.bf16.msra.mxu1 %v1363_v28 }
  0x50   :  { %1365 = vmatprep.subr.bf16.mxu1 %v1385_v10 }
  0x52   :  { %1259 = vmatmul.mubr.msk.f32.gmra.mrb[36].mxu0 %vm84_vm0, %v57_v63 }
  0x53   :  { %1261 = vmatprep.mubr.msk.f32.mxu0 %vm84_vm0, %v58_v0  ;;  %1367 = vmatpush3.bf16.msra.mxu1 %v1366_v31 }
  0x56   :  { %1262 = vmatmul.mubr.msk.f32.gmra.mrb[38].mxu0 %vm84_vm0, %v59_v1 }
  0x57   :  { %1264 = vmatprep.mubr.msk.f32.mxu0 %vm84_vm0, %v60_v2  ;;  %v1793_v2 = vld [vmem:[%s2032_s2 + $0x60] sm:$0xff] }
  0x5a   :  { %1265 = vmatmul.mubr.msk.f32.gmra.mrb[40].mxu0 %vm84_vm0, %v61_v3 }
  0xdd   :  { %v1206_v32 = vpop.f32.mrb[0].mxu0  ;;  %v1750_v39 = vpop.f32.mrb[0].mxu1 }
  0xde   :  { %v347_v33 = vpop.f32.mrb[1].mxu0  ;;  %v699_v40 = vadd.f32 %v1206_v32, %v1733_v34  ;;  %v1754_v43 = vpop.f32.mrb[1].mxu1  ;;  %v1841_v32 = vld [vmem:[%s2032_s2 + $0x90] sm:$0xff] }
  0xdf   :  { %v698_v44 = vadd.f32 %v1743_v36, %v347_v33 }
  0xe1   :  { %v1209_v38 = vpop.f32.mrb[2].mxu0  ;;  %v1768_v51 = vpop.f32.mrb[2].mxu1 }
  0xe2   :  { %v701_v41 = vadd.f32 %v1209_v38, %v1738_v35  ;;  %v357_v42 = vpop.f32.mrb[3].mxu0  ;;  %v1771_v54 = vpop.f32.mrb[3].mxu1  ;;  %v1846_v38 = vld [vmem:[%s2032_s2 + $0x88] sm:$0xff] }
  0xe3   :  { %v700_v45 = vadd.f32 %v1748_v37, %v357_v42 }
  0xe4   :  { %v763_v47 = vmax.f32 %v699_v40, %v701_v41 }
  0xe5   :  { %v762_v49 = vmax.f32 %v698_v44, %v700_v45  ;;  %v1212_v50 = vpop.f32.mrb[4].mxu0  ;;  %v1784_v61 = vpop.f32.mrb[4].mxu1 }
  0xe6   :  { %v703_v52 = vadd.f32 %v1212_v50, %v1761_v46  ;;  %v367_v53 = vpop.f32.mrb[5].mxu0  ;;  %v1787_v0 = vpop.f32.mrb[5].mxu1  ;;  %v1857_v50 = vld [vmem:[%s2032_s2 + $0xa0] sm:$0xff] }
  0xe7   :  { %v702_v55 = vadd.f32 %v1766_v48, %v367_v53  ;;  %v1862_v53 = vld [vmem:[%s2032_s2 + $0x98] sm:$0xff] }
  0xe8   :  { %v765_v57 = vmax.f32 %v763_v47, %v703_v52 }
  0xe9   :  { %v764_v59 = vmax.f32 %v762_v49, %v702_v55  ;;  %v1215_v60 = vpop.f32.mrb[6].mxu0  ;;  %v1800_v7 = vpop.f32.mrb[6].mxu1 }
  0xea   :  { %v705_v62 = vadd.f32 %v1215_v60, %v1777_v56  ;;  %v377_v63 = vpop.f32.mrb[7].mxu0  ;;  %v1803_v10 = vpop.f32.mrb[7].mxu1 }
  0xeb   :  { %v704_v1 = vadd.f32 %v1782_v58, %v377_v63 }
  0xec   :  { %v767_v3 = vmax.f32 %v765_v57, %v705_v62 }
  0xed   :  { %v766_v5 = vmax.f32 %v764_v59, %v704_v1  ;;  %v1218_v6 = vpop.f32.mrb[8].mxu0  ;;  %v1816_v17 = vpop.f32.mrb[8].mxu1 }
  0xee   :  { %v707_v8 = vadd.f32 %v1218_v6, %v1793_v2  ;;  %v387_v9 = vpop.f32.mrb[9].mxu0  ;;  %v1819_v20 = vpop.f32.mrb[9].mxu1  ;;  %v1878_v6 = vld [vmem:[%s2032_s2 + $0xa8] sm:$0xff] }
  0xef   :  { %v706_v11 = vadd.f32 %v1798_v4, %v387_v9 }
  0xf0   :  { %v769_v13 = vmax.f32 %v767_v3, %v707_v8  ;;  %v1873_v3 = vld [vmem:[%s2032_s2 + $0xb0] sm:$0xff] }
  0xf1   :  { %v768_v15 = vmax.f32 %v766_v5, %v706_v11  ;;  %v1221_v16 = vpop.f32.mrb[10].mxu0  ;;  %v1832_v27 = vpop.f32.mrb[10].mxu1 }
  0xf2   :  { %v709_v18 = vadd.f32 %v1221_v16, %v1809_v12  ;;  %v397_v19 = vpop.f32.mrb[11].mxu0  ;;  %v1835_v30 = vpop.f32.mrb[11].mxu1 }
  0xf3   :  { %v708_v21 = vadd.f32 %v1814_v14, %v397_v19  ;;  %v1889_v19 = vld [vmem:[%s2032_s2 + $0xc0] sm:$0xff] }
  0xf4   :  { %v771_v23 = vmax.f32 %v769_v13, %v709_v18 }
  0xf5   :  { %v770_v25 = vmax.f32 %v768_v15, %v708_v21  ;;  %v1224_v26 = vpop.f32.mrb[12].mxu0  ;;  %v1848_v42 = vpop.f32.mrb[12].mxu1 }
  0xf6   :  { %v711_v28 = vadd.f32 %v1224_v26, %v1825_v22  ;;  %v407_v29 = vpop.f32.mrb[13].mxu0  ;;  %v1851_v47 = vpop.f32.mrb[13].mxu1 }
  0xf7   :  { %v710_v31 = vadd.f32 %v1830_v24, %v407_v29 }
  0xf8   :  { %v773_v33 = vmax.f32 %v771_v23, %v711_v28  ;;  %v1894_v23 = vld [vmem:[%s2032_s2 + $0xb8] sm:$0xff] }
  0xf9   :  { %v772_v40 = vmax.f32 %v770_v25, %v710_v31  ;;  %v1227_v41 = vpop.f32.mrb[14].mxu0  ;;  %v1864_v59 = vpop.f32.mrb[14].mxu1 }
  0xfa   :  { %v713_v44 = vadd.f32 %v1227_v41, %v1841_v32  ;;  %v417_v45 = vpop.f32.mrb[15].mxu0  ;;  %v1867_v63 = vpop.f32.mrb[15].mxu1  ;;  %v1905_v41 = vld [vmem:[%s2032_s2 + $0xd0] sm:$0xff] }
  0xfb   :  { %v712_v49 = vadd.f32 %v1846_v38, %v417_v45  ;;  %v1910_v45 = vld [vmem:[%s2032_s2 + $0xc8] sm:$0xff] }
  0xfc   :  { %v775_v52 = vmax.f32 %v773_v33, %v713_v44 }
  0xfd   :  { %v774_v55 = vmax.f32 %v772_v40, %v712_v49  ;;  %v1230_v57 = vpop.f32.mrb[16].mxu0  ;;  %v1880_v11 = vpop.f32.mrb[16].mxu1 }
  0xfe   :  { %v715_v60 = vadd.f32 %v1230_v57, %v1857_v50  ;;  %v427_v62 = vpop.f32.mrb[17].mxu0  ;;  %v1883_v16 = vpop.f32.mrb[17].mxu1 }
  0xff   :  { %v714_v1 = vadd.f32 %v1862_v53, %v427_v62  ;;  %2041 = vst [vmem:[#allocation2_spill] sm:$0xff] %v1883_v16 }
 0x100   :  { %v777_v5 = vmax.f32 %v775_v52, %v715_v60 }
 0x101   :  { %v776_v8 = vmax.f32 %v774_v55, %v714_v1  ;;  %v1233_v9 = vpop.f32.mrb[18].mxu0  ;;  %v1896_v28 = vpop.f32.mrb[18].mxu1 }
 0x102   :  { %v717_v13 = vadd.f32 %v1233_v9, %v1873_v3  ;;  %v437_v15 = vpop.f32.mrb[19].mxu0  ;;  %2042 = vst [vmem:[#allocation3_spill] sm:$0xff] %v1896_v28  ;;  %v1899_v33 = vpop.f32.mrb[19].mxu1  ;;  %v1926_v9 = vld [vmem:[%s2032_s2 + $0xd8] sm:$0xff] }
 0x103   :  { %v716_v18 = vadd.f32 %v1878_v6, %v437_v15  ;;  %2043 = vst [vmem:[#allocation4_spill] sm:$0xff] %v1899_v33 }
 0x104   :  { %v779_v21 = vmax.f32 %v777_v5, %v717_v13  ;;  %v1921_v5 = vld [vmem:[%s2032_s2 + $0xe0] sm:$0xff] }
 0x105   :  { %v778_v25 = vmax.f32 %v776_v8, %v716_v18  ;;  %v1236_v26 = vpop.f32.mrb[20].mxu0  ;;  %v1912_v55 = vpop.f32.mrb[20].mxu1 }
 0x106   :  { %v719_v29 = vadd.f32 %v1236_v26, %v1889_v19  ;;  %v447_v31 = vpop.f32.mrb[21].mxu0  ;;  %2044 = vst [vmem:[#allocation5_spill] sm:$0xff] %v1912_v55  ;;  %v1915_v62 = vpop.f32.mrb[21].mxu1  ;;  %v1933_v26 = vld [vmem:[%s2032_s2 + $0xf0] sm:$0xff] }
 0x107   :  { %v718_v40 = vadd.f32 %v1894_v23, %v447_v31  ;;  %2045 = vst [vmem:[#allocation6_spill] sm:$0xff] %v1915_v62  ;;  %v1938_v31 = vld [vmem:[%s2032_s2 + $0xe8] sm:$0xff] }
 0x108   :  { %v781_v44 = vmax.f32 %v779_v21, %v719_v29  ;;  %2046 = vst [vmem:[#allocation7_spill] sm:$0xff] %v1938_v31 }
 0x109   :  { %v780_v49 = vmax.f32 %v778_v25, %v718_v40  ;;  %v1239_v52 = vpop.f32.mrb[22].mxu0 }
 0x10a   :  { %v721_v57 = vadd.f32 %v1239_v52, %v1905_v41  ;;  %v457_v60 = vpop.f32.mrb[23].mxu0 }
 0x10b   :  { %v720_v1 = vadd.f32 %v1910_v45, %v457_v60  ;;  %v1945_v60 = vld [vmem:[%s2032_s2 + $0x100] sm:$0xff] }
 0x10c   :  { %v783_v8 = vmax.f32 %v781_v44, %v721_v57  ;;  %2047 = vst [vmem:[#allocation8_spill] sm:$0xff] %v1945_v60 }
 0x10d   :  { %v782_v13 = vmax.f32 %v780_v49, %v720_v1  ;;  %v1242_v15 = vpop.f32.mrb[24].mxu0 }
 0x10e   :  { %v723_v18 = vadd.f32 %v1242_v15, %v1921_v5  ;;  %v467_v21 = vpop.f32.mrb[25].mxu0 }
 0x10f   :  { %v722_v25 = vadd.f32 %v1926_v9, %v467_v21 }
 0x110   :  { %v785_v29 = vmax.f32 %v783_v8, %v723_v18  ;;  %v1950_v8 = vld [vmem:[%s2032_s2 + $0xf8] sm:$0xff] }
 0x111   :  { %v784_v40 = vmax.f32 %v782_v13, %v722_v25  ;;  %v1245_v44 = vpop.f32.mrb[26].mxu0  ;;  %2048 = vst [vmem:[#allocation9_spill] sm:$0xff] %v1950_v8 }
 0x112   :  { %v725_v49 = vadd.f32 %v1245_v44, %v1933_v26  ;;  %v477_v52 = vpop.f32.mrb[27].mxu0  ;;  %v1957_v44 = vld [vmem:[%s2032_s2 + $0x110] sm:$0xff] }
 0x113   :  { %v724_v57 = vadd.f32 %v1938_v31, %v477_v52  ;;  %2049 = vst [vmem:[#allocation10_spill] sm:$0xff] %v1957_v44 }
 0x114   :  { %v787_v1 = vmax.f32 %v785_v29, %v725_v49  ;;  %v1962_v29 = vld [vmem:[%s2032_s2 + $0x108] sm:$0xff] }
 0x115   :  { %v786_v15 = vmax.f32 %v784_v40, %v724_v57  ;;  %v1248_v18 = vpop.f32.mrb[28].mxu0 }
 0x116   :  { %v727_v13 = vadd.f32 %v1248_v18, %v1945_v60  ;;  %v487_v21 = vpop.f32.mrb[29].mxu0 }
 0x117   :  { %v726_v25 = vadd.f32 %v1950_v8, %v487_v21 }
 0x118   :  { %v789_v52 = vmax.f32 %v787_v1, %v727_v13 }
 0x119   :  { %v788_v49 = vmax.f32 %v786_v15, %v726_v25  ;;  %v1251_v62 = vpop.f32.mrb[30].mxu0 }
 0x11a   :  { %v729_v40 = vadd.f32 %v1251_v62, %v1957_v44  ;;  %v497_v57 = vpop.f32.mrb[31].mxu0 }
 0x11b   :  { %v728_v18 = vadd.f32 %v1962_v29, %v497_v57 }
 0x11c   :  { %v791_v33 = vmax.f32 %v789_v52, %v729_v40 }
 0x11d   :  { %v790_v21 = vmax.f32 %v788_v49, %v728_v18  ;;  %v1254_v8 = vpop.f32.mrb[32].mxu0 }
 0x11e   :  { %v507_v55 = vpop.f32.mrb[33].mxu0  ;;  %v731_v1 = vadd.f32 %v1254_v8, %v1733_v34 }
 0x11f   :  { %v792_v28 = vmax.f32 %v790_v21, %v791_v33  ;;  %v730_v16 = vadd.f32 %v1743_v36, %v507_v55 }
 0x121   :  { %v1257_v60 = vpop.f32.mrb[34].mxu0 }
 0x122   :  { %v733_v13 = vadd.f32 %v1257_v60, %v1738_v35  ;;  %v517_v31 = vpop.f32.mrb[35].mxu0 }
 0x123   :  { %v732_v15 = vadd.f32 %v1748_v37, %v517_v31 }
 0x124   :  { %v800_v25 = vmax.f32 %v731_v1, %v733_v13  ;;  %v742_v1 = vadd.f32 %v1830_v24, %v1771_v54  ;;  %v749_v54 = vadd.f32 %v1816_v17, %v1873_v3  ;;  %v752_v17 = vadd.f32 %v1910_v45, %v1851_v47  ;;  %v2052_v47 = vld [vmem:[#allocation8_spill] sm:$0xff]  ;;  %v2053_v45 = vld [vmem:[#allocation3_spill] sm:$0xff] }
 0x125   :  { %v799_v62 = vmax.f32 %v730_v16, %v732_v15  ;;  %v1260_v44 = vpop.f32.mrb[36].mxu0  ;;  %v793_v3 = vrot.slane %v792_v28, 4 }
 0x126   :  { %v735_v57 = vadd.f32 %v1260_v44, %v1761_v46  ;;  %v527_v52 = vpop.f32.mrb[37].mxu0  ;;  %v741_v46 = vadd.f32 %v1750_v39, %v1809_v12  ;;  %v740_v44 = vadd.f32 %v1814_v14, %v1754_v43  ;;  %v744_v39 = vadd.f32 %v1846_v38, %v1787_v0 }
 0x127   :  { %v734_v49 = vadd.f32 %v1766_v48, %v527_v52  ;;  %v747_v43 = vadd.f32 %v1800_v7, %v1857_v50  ;;  %v751_v0 = vadd.f32 %v1832_v27, %v1889_v19  ;;  %v750_v7 = vadd.f32 %v1894_v23, %v1835_v30 }
 0x128   :  { %v802_v40 = vmax.f32 %v800_v25, %v735_v57  ;;  %v754_v27 = vadd.f32 %v1926_v9, %v1867_v63  ;;  %v757_v30 = vadd.f32 %v1880_v11, %v1933_v26  ;;  %v794_v57 = vmax.f32 %v792_v28, %v793_v3  ;;  %v2058_v9 = vld [vmem:[#allocation6_spill] sm:$0xff] }
 0x129   :  { %v801_v33 = vmax.f32 %v799_v62, %v734_v49  ;;  %v1263_v18 = vpop.f32.mrb[38].mxu0  ;;  %v2050_v62 = vld [vmem:[#allocation2_spill] sm:$0xff]  ;;  %v759_v49 = vadd.f32 %v2053_v45, %v2052_v47 }
 0x12a   :  { %v737_v34 = vadd.f32 %v1263_v18, %v1777_v56  ;;  %v537_v8 = vpop.f32.mrb[39].mxu0  ;;  %v743_v56 = vadd.f32 %v1768_v51, %v1825_v22  ;;  %v746_v51 = vadd.f32 %v1862_v53, %v1803_v10  ;;  %v753_v10 = vadd.f32 %v1848_v42, %v1905_v41  ;;  %v2051_v42 = vld [vmem:[#allocation7_spill] sm:$0xff]  ;;  %v2056_v18 = vld [vmem:[#allocation4_spill] sm:$0xff] }
 0x12b   :  { %v736_v35 = vadd.f32 %v1782_v58, %v537_v8  ;;  %v756_v41 = vadd.f32 %v2051_v42, %v2050_v62  ;;  %v760_v8 = vadd.f32 %v1962_v29, %v2058_v9 }
 0x12c   :  { %v804_v60 = vmax.f32 %v802_v40, %v737_v34  ;;  %v2054_v40 = vld [vmem:[#allocation10_spill] sm:$0xff]  ;;  %v2057_v34 = vld [vmem:[#allocation9_spill] sm:$0xff] }
 0x12d   :  { %v803_v36 = vmax.f32 %v801_v33, %v736_v35  ;;  %v1266_v55 = vpop.f32.mrb[40].mxu0  ;;  %v2055_v33 = vld [vmem:[#allocation5_spill] sm:$0xff]  ;;  %v758_v63 = vadd.f32 %v2057_v34, %v2056_v18  ;;  %v795_v35 = vrot.slane %v794_v57, 2 }
 0x12e   :  { %v739_v37 = vadd.f32 %v1266_v55, %v1793_v2  ;;  %v547_v16 = vpop.f32.mrb[41].mxu0  ;;  %v745_v2 = vadd.f32 %v1784_v61, %v1841_v32  ;;  %v748_v61 = vadd.f32 %v1878_v6, %v1819_v20  ;;  %v755_v20 = vadd.f32 %v1864_v59, %v1921_v5 }
 0x12f   :  { %v738_v31 = vadd.f32 %v1798_v4, %v547_v16  ;;  %v761_v59 = vadd.f32 %v2055_v33, %v2054_v40  ;;  %v796_v55 = vmax.f32 %v794_v57, %v795_v35 }
 0x130   :  { %v806_v48 = vmax.f32 %v804_v60, %v739_v37 }
 0x131   :  { %v805_v21 = vmax.f32 %v803_v36, %v738_v31  ;;  %v797_v31 = vrot.slane %v796_v55, 1 }
 0x132   :  { %v808_v58 = vmax.f32 %v806_v48, %v741_v46 }
 0x133   :  { %v807_v13 = vmax.f32 %v805_v21, %v740_v44  ;;  %v798_v44 = vmax.f32 %v796_v55, %v797_v31 }
 0x134   :  { %v810_v4 = vmax.f32 %v808_v58, %v743_v56 }
 0x135   :  { %v809_v12 = vmax.f32 %v807_v13, %v742_v1  ;;  %1375 = vtanh.f32 %v798_v44  ;;  %v931_v13 = vpop.f32.mrb[22].mxu1 }
 0x136   :  { %v812_v14 = vmax.f32 %v810_v4, %v745_v2  ;;  %v1304_v2 = vpop.f32.mrb[23].mxu1  ;;  %v1109_v4 = vld [vmem:[%s2034_s3 + $0x88] ss:$0 sm:$0xff] }
 0x137   :  { %v811_v22 = vmax.f32 %v809_v12, %v744_v39 }
 0x138   :  { %v814_v24 = vmax.f32 %v812_v14, %v747_v43 }
 0x139   :  { %v813_v32 = vmax.f32 %v811_v22, %v746_v51  ;;  %v1110_v51 = vld [vmem:[%s2034_s3 + $0x90] ss:$0 sm:$0xff] }
 0x13a   :  { %v816_v38 = vmax.f32 %v814_v24, %v749_v54 }
 0x13b   :  { %v815_v50 = vmax.f32 %v813_v32, %v748_v61  ;;  %v1111_v61 = vld [vmem:[%s2034_s3 + $0x98] ss:$0 sm:$0xff] }
 0x13c   :  { %v818_v15 = vmax.f32 %v816_v38, %v751_v0 }
 0x13d   :  { %v817_v53 = vmax.f32 %v815_v50, %v750_v7 }
 0x13e   :  { %v820_v25 = vmax.f32 %v818_v15, %v753_v10 }
 0x13f   :  { %v819_v6 = vmax.f32 %v817_v53, %v752_v17  ;;  %v1376_v58 = vpop.eup %1375 }
 0x140   :  { %v822_v19 = vmax.f32 %v820_v25, %v755_v20 }
 0x141   :  { %v821_v23 = vmax.f32 %v819_v6, %v754_v27 }
 0x142   :  { %v824_v52 = vmax.f32 %v822_v19, %v757_v30 }
 0x143   :  { %v823_v5 = vmax.f32 %v821_v23, %v756_v41 }
 0x144   :  { %v826_v11 = vmax.f32 %v824_v52, %v759_v49 }
 0x145   :  { %v825_v26 = vmax.f32 %v823_v5, %v758_v63 }
 0x146   :  { %v828_v60 = vmax.f32 %v826_v11, %v761_v59 }
 0x147   :  { %v827_v36 = vmax.f32 %v825_v26, %v760_v8 }
 0x149   :  { %v829_v28 = vmax.f32 %v827_v36, %v828_v60 }
 0x14b   :  { %v830_v37 = vrot.slane %v829_v28, 4 }
 0x14d   :  { %v831_v16 = vmax.f32 %v829_v28, %v830_v37 }
 0x14f   :  { %v832_v46 = vrot.slane %v831_v16, 2 }
 0x151   :  { %v833_v48 = vmax.f32 %v831_v16, %v832_v46 }
 0x153   :  { %v834_v21 = vrot.slane %v833_v48, 1 }
 0x155   :  { %v835_v56 = vmax.f32 %v833_v48, %v834_v21 }
 0x157   :  { %1377 = vtanh.f32 %v835_v56 }
 0x161   :  { %v1378_v29 = vpop.eup %1377 }
 0x162   :  { %v938_v1 = vsel %vm937_vm5, %v1378_v29, %v1376_v58 }
 0x163   :  { %1338 = vmatmul.mubr.f32.vlgmr.msra.gmra.mrb[24].mxu1 %v938_v1 }
 0x236   :  { %v1006_v39 = vpop.f32.mrb[24].mxu1 }
 0x237   :  { %v1007_v12 = vadd.f32 %v1006_v39, %v931_v13  ;;  %v1339_v43 = vpop.f32.mrb[25].mxu1 }
 0x239   :  { %v1014_v14 = vadd.f32 %v1109_v4, %v1007_v12 }
 0x23b   :  { %1379 = vtanh.f32 %v1014_v14 }
 0x245   :  { %v1380_v22 = vpop.eup %1379 }
 0x246   :  { %v1022_v54 = vmul.f32 %v1380_v22, %v1110_v51 }
 0x248   :  { %v1024_v24 = vsel %vm1023_vm6, %v1022_v54, 0.0 }
 0x249   :  { %1025 = vadd.xlane.f32.xlu0 %v1024_v24 }
 0x2d6   :  { %v1026_v32 = vpop.xlane.xlu0 %1025 }
 0x2d7   :  { %v1031_v0 = vadd.f32 %v1111_v61, %v1026_v32 }
 0x2d9   :  { %v1032_v38 = vmul.f32 0.5, %v1031_v0 }
 0x2db   :  { %1381 = vtanh.f32 %v1032_v38 }
 0x2e5   :  { %v1382_v7 = vpop.eup %1381 }
 0x2e6   :  { %v1034_v50 = vadd.f32 1.0, %v1382_v7 }
 0x2e8   :  { %v1035_v15 = vmul.f32 0.5, %v1034_v50 }
 0x2ea   :  { %1037 = vst.msk [vmem:[%s2036_s4] sm:$0x3] %vm1036_vm7, %v1035_v15 }

</bundles_post_ra>
